<compile_context>
chip_gen: v6e
topology: v6e:2x2x1
jax: 0.10.0
libtpu: 0.0.40
codegen_flags: <defaults>
</compile_context>

<pallas_src>
import jax
import jax.numpy as jnp
from jax.experimental import pallas as pl
from jax.experimental.pallas import tpu as pltpu


def _attr_head_kernel(x_ref, w_ref, shift_ref, o_ref, acc_ref):
    # x_ref:     (TN, C, THW)   feature tile; C on sublanes, HW on lanes
    # w_ref:     (C, K)         classifier weight with BN scale & 1/HW folded in
    # shift_ref: (1, K)         folded BN shift
    # o_ref:     (TN, K)        sigmoid(BN(Linear(pool(x))))
    # acc_ref:   (TN, C, LB)    f32 persistent lane-block accumulator
    j = pl.program_id(1)

    @pl.when(j == 0)
    def _init():
        acc_ref[...] = jnp.zeros_like(acc_ref)

    thw = x_ref.shape[-1]
    lb = acc_ref.shape[-1]          # 128 (multiple-of-128 path) or full THW
    # VPU accumulation: plain vreg adds on the VALU slots, per-slice upcast.
    # All cross-lane work is deferred to the finalize step.
    for s in range(thw // lb):
        acc_ref[...] += x_ref[:, :, s * lb:(s + 1) * lb].astype(jnp.float32)

    @pl.when(j == pl.num_programs(1) - 1)
    def _finalize():
        pooled = jnp.sum(acc_ref[...], axis=-1)                  # (TN, C); one XLU reduce
        logits = jnp.dot(pooled, w_ref[...],
                         preferred_element_type=jnp.float32)     # (TN, K)
        o_ref[...] = jax.nn.sigmoid(logits + shift_ref[...]).astype(o_ref.dtype)


def _round_up(v, m):
    return -(-v // m) * m


def _vmem_capacity_bytes():
    try:
        info = pltpu.get_tpu_info()
        cap = getattr(info, "vmem_capacity_bytes", None)
        if cap:
            return int(cap)
    except Exception:
        pass
    return 64 << 20   # conservative fallback: v7x per-TensorCore VMEM


def _acc_lane_block(thw):
    return 128 if thw % 128 == 0 else thw


def _footprint_bytes(tn, thw, c, k, itemsize):
    """Rough resident-VMEM footprint for a given (TN, THW) tiling."""
    c_pad = _round_up(c, 8)
    k_pad = _round_up(k, 128)
    lb = _acc_lane_block(thw)
    x_buf = tn * c_pad * _round_up(thw, 128) * itemsize
    acc = tn * c_pad * _round_up(lb, 128) * 4
    w_buf = c_pad * k_pad * 4
    out_buf = _round_up(tn, 8) * k_pad * 4
    # 2x x (double buffer) + acc + one acc-sized upcast temp + 2x weight
    # + 2x output + shift + slack.
    return 2 * x_buf + 2 * acc + 2 * w_buf + 2 * out_buf + k_pad * 4 + (256 << 10)


def _choose_tiles(n_pad, c, hw, k, itemsize, budget_bytes):
    # 1) Spatial tile: prefer the full, contiguous per-sample slab.  Only
    #    split HW (multiples of 128 that divide HW) if one sample does not fit.
    thw = hw
    if (_footprint_bytes(8, hw, c, k, itemsize) > budget_bytes
            and hw % 128 == 0 and hw > 128):
        thw = 128
        for m in range(hw // 128, 0, -1):
            t = m * 128
            if hw % t == 0 and _footprint_bytes(8, t, c, k, itemsize) <= budget_bytes:
                thw = t
                break

    # 2) Batch tile: largest multiple of 8 dividing n_pad that fits the
    #    budget, capped so there are >= 2 N tiles once n_pad >= 16
    #    (v7x megacore split on the "parallel" axis + pipeline overlap).
    tn_cap = n_pad if n_pad < 16 else n_pad // 2
    tn = 8
    t = 8
    while t <= tn_cap:
        if n_pad % t == 0 and _footprint_bytes(t, thw, c, k, itemsize) <= budget_bytes:
            tn = t
        t += 8
    return tn, thw


def attr_head_forward(features_nchw, w, bn_gamma, bn_beta, bn_mean, bn_var,
                      eps=1e-5, _force_thw=None):
    """AttrHead inference forward.

    features_nchw: (N, C, H, W) backbone features (f32 or bf16).
    w:             (K, C) classifier weight (Linear, bias=False).
    bn_*:          BatchNorm1d(num_classes) affine params / running stats.
    """
    n, c, h, wdt = features_nchw.shape
    k = w.shape[0]
    hw = h * wdt
    itemsize = features_nchw.dtype.itemsize

    # Free, contiguous view: NCHW -> (N, C, HW).
    x = features_nchw.reshape(n, c, hw)

    # Pad N to a multiple of 8 so every block stays sublane-legal and bounded
    # (no single-oversized-block fallback); the padded rows are sliced off.
    n_pad = _round_up(n, 8)
    if n_pad != n:
        x = jnp.pad(x, ((0, n_pad - n), (0, 0), (0, 0)))

    # Fold BN running stats and the 1/(H*W) pooling divisor into the
    # classifier weight columns; only a per-class shift remains in-kernel.
    bn_scale = (bn_gamma / jnp.sqrt(bn_var + eps)).astype(jnp.float32)
    w_folded = w.astype(jnp.float32).T * (bn_scale / hw)[None, :]   # (C, K)
    shift = (bn_beta - bn_mean * bn_scale).reshape(1, k).astype(jnp.float32)

    # Generation-aware VMEM budget.
    vmem_cap = _vmem_capacity_bytes()
    vmem_limit = (vmem_cap * 3) // 4            # ~48 MiB on v7x, ~96 MiB on v5e/v6e
    budget = (vmem_limit * 17) // 20            # leave compiler headroom

    tn, thw = _choose_tiles(n_pad, c, hw, k, itemsize, budget)
    if _force_thw is not None:                  # test hook: force HW splitting
        assert hw % _force_thw == 0 and (_force_thw % 128 == 0 or _force_thw == hw)
        thw = _force_thw
    acc_lb = _acc_lane_block(thw)

    need = _footprint_bytes(tn, thw, c, k, itemsize)
    vmem_limit = max(vmem_limit, min(vmem_cap - (4 << 20), int(need * 1.2)))

    grid = (n_pad // tn, hw // thw)
    cost = pl.CostEstimate(
        flops=n_pad * c * hw + 2 * n_pad * c * k,
        transcendentals=n_pad * k,
        bytes_accessed=n_pad * c * hw * itemsize + c * k * 4 + (n_pad + 1) * k * 4,
    )

    out = pl.pallas_call(
        _attr_head_kernel,
        out_shape=jax.ShapeDtypeStruct((n_pad, k), jnp.float32),
        grid_spec=pltpu.PrefetchScalarGridSpec(
            num_scalar_prefetch=0,
            grid=grid,
            in_specs=[
                pl.BlockSpec((tn, c, thw), lambda i, j: (i, 0, j)),
                pl.BlockSpec((c, k), lambda i, j: (0, 0)),
                pl.BlockSpec((1, k), lambda i, j: (0, 0)),
            ],
            out_specs=pl.BlockSpec((tn, k), lambda i, j: (i, 0)),
            scratch_shapes=[pltpu.VMEM((tn, c, acc_lb), jnp.float32)],
        ),
        compiler_params=pltpu.CompilerParams(
            dimension_semantics=("parallel", "arbitrary"),
            vmem_limit_bytes=int(vmem_limit)),
        cost_estimate=cost,
    )(x, w_folded, shift)

    return out[:n]


def _reference(features_nchw, w, bn_gamma, bn_beta, bn_mean, bn_var, eps=1e-5):
    pooled = jnp.mean(features_nchw, axis=(2, 3))                  # (N, C)
    logits = pooled @ w.T                                          # (N, K)
    y = (logits - bn_mean) / jnp.sqrt(bn_var + eps) * bn_gamma + bn_beta
    return jax.nn.sigmoid(y)


if __name__ == "__main__":
    key = jax.random.PRNGKey(0)
    kx, kw, kg, kb, km, kv = jax.random.split(key, 6)

    # Small, module-consistent shapes: feat_dim=32 channels, 16 classes.
    N, C, H, W = 2, 32, 16, 16        # backbone features (NCHW), HW = 256
    K = 16

    features = jax.random.normal(kx, (N, C, H, W), dtype=jnp.float32)
    # classifier: nn.Linear(feat_dim, num_classes, bias=False), std=0.001 init.
    w_cls = 0.001 * jax.random.normal(kw, (K, C), dtype=jnp.float32)
    # bottleneck: BatchNorm1d(num_classes) with nontrivial running stats.
    bn_gamma = 1.0 + 0.1 * jax.random.normal(kg, (K,), dtype=jnp.float32)
    bn_beta = 0.1 * jax.random.normal(kb, (K,), dtype=jnp.float32)
    bn_mean = 0.05 * jax.random.normal(km, (K,), dtype=jnp.float32)
    bn_var = jnp.abs(jax.random.normal(kv, (K,), dtype=jnp.float32)) + 0.5

    ref = _reference(features, w_cls, bn_gamma, bn_beta, bn_mean, bn_var)

    # 1) Default tiling: full-HW contiguous slab, single reduction step,
    #    128-lane-slice VPU accumulation.
    out = jax.block_until_ready(
        attr_head_forward(features, w_cls, bn_gamma, bn_beta, bn_mean, bn_var))
    assert out.shape == (N, K)
    assert jnp.allclose(out, ref, atol=1e-5, rtol=1e-5), "mismatch (default tiling)"

    # 2) Forced HW split (THW=128 -> 2 reduction steps): exercises the
    #    persistent accumulator init/accumulate/finalize path.
    out2 = jax.block_until_ready(
        attr_head_forward(features, w_cls, bn_gamma, bn_beta, bn_mean, bn_var,
                          _force_thw=128))
    assert jnp.allclose(out2, ref, atol=1e-5, rtol=1e-5), "mismatch (split HW)"

    # 3) HW not a multiple of 128 (full-tile accumulate path) and batch not a
    #    multiple of 8 (N padding + >= 2 N tiles on the parallel axis).
    N2, H2, W2 = 9, 6, 6
    f2 = jax.random.normal(kx, (N2, C, H2, W2), dtype=jnp.float32)
    ref2 = _reference(f2, w_cls, bn_gamma, bn_beta, bn_mean, bn_var)
    out3 = jax.block_until_ready(
        attr_head_forward(f2, w_cls, bn_gamma, bn_beta, bn_mean, bn_var))
    assert out3.shape == (N2, K)
    assert jnp.allclose(out3, ref2, atol=1e-5, rtol=1e-5), "mismatch (odd shapes)"

    # 4) bf16 feature maps (halved HBM traffic); accumulation/dot stay f32.
    f_bf16 = features.astype(jnp.bfloat16)
    ref_bf = _reference(f_bf16.astype(jnp.float32), w_cls, bn_gamma, bn_beta,
                        bn_mean, bn_var)
    out4 = jax.block_until_ready(
        attr_head_forward(f_bf16, w_cls, bn_gamma, bn_beta, bn_mean, bn_var))
    assert jnp.allclose(out4, ref_bf, atol=1e-4, rtol=1e-4), "mismatch (bf16)"

    print("KERNEL_OK")
</pallas_src>

<mosaic_0001>
module attributes {stable_mosaic.version = 11 : i64} {
  func.func @_attr_head_kernel(%arg0: i32, %arg1: i32, %arg2: memref<8x32x256xf32, #tpu.memory_space<vmem>>, %arg3: memref<32x16xf32, #tpu.memory_space<vmem>>, %arg4: memref<1x16xf32, #tpu.memory_space<vmem>>, %arg5: memref<8x16xf32, #tpu.memory_space<vmem>>, %arg6: memref<8x32x128xf32, #tpu.memory_space<vmem>>) attributes {dimension_semantics = [#tpu.dimension_semantics<parallel>, #tpu.dimension_semantics<arbitrary>], iteration_bounds = array<i64: 1, 1>, scalar_prefetch = 0 : i64, scratch_operands = 1 : i64, tpu.core_type = #tpu.core_type<tc>, window_params = [{transform_indices = @transform_0, window_bounds = array<i64: 8, 32, 256>}, {pipeline_mode = #tpu.pipeline_mode<synchronous>, transform_indices = @transform_1, window_bounds = array<i64: 32, 16>}, {pipeline_mode = #tpu.pipeline_mode<synchronous>, transform_indices = @transform_2, window_bounds = array<i64: 1, 16>}, {transform_indices = @transform_3, window_bounds = array<i64: 8, 16>}]} {
    %c0_i32 = arith.constant 0 : i32
    %0 = arith.cmpi eq, %arg1, %c0_i32 : i32
    %1 = arith.extui %0 : i1 to i32
    %c0_i32_0 = arith.constant 0 : i32
    %2 = arith.cmpi ne, %1, %c0_i32_0 : i32
    scf.if %2 {
      %cst = arith.constant 0.000000e+00 : f32
      %14 = vector.broadcast %cst : f32 to vector<8x32x128xf32>
      %c0_19 = arith.constant 0 : index
      %c0_20 = arith.constant 0 : index
      %c0_21 = arith.constant 0 : index
      %15 = vector.load %arg6[%c0_19, %c0_20, %c0_21] : memref<8x32x128xf32, #tpu.memory_space<vmem>>, vector<8x32x128xf32>
      tpu.vector_store %arg6[%c0_19, %c0_20, %c0_21], %14 {strides = array<i32>} : memref<8x32x128xf32, #tpu.memory_space<vmem>>, vector<8x32x128xf32>,
    } else {
    }
    %c0 = arith.constant 0 : index
    %c0_1 = arith.constant 0 : index
    %c0_2 = arith.constant 0 : index
    %3 = vector.load %arg6[%c0, %c0_1, %c0_2] : memref<8x32x128xf32, #tpu.memory_space<vmem>>, vector<8x32x128xf32>
    %c0_3 = arith.constant 0 : index
    %c0_4 = arith.constant 0 : index
    %c0_5 = arith.constant 0 : index
    %4 = vector.load %arg2[%c0_3, %c0_4, %c0_5] : memref<8x32x256xf32, #tpu.memory_space<vmem>>, vector<8x32x128xf32>
    %5 = arith.addf %3, %4 : vector<8x32x128xf32>
    %c0_6 = arith.constant 0 : index
    %c0_7 = arith.constant 0 : index
    %c0_8 = arith.constant 0 : index
    %6 = vector.load %arg6[%c0_6, %c0_7, %c0_8] : memref<8x32x128xf32, #tpu.memory_space<vmem>>, vector<8x32x128xf32>
    tpu.vector_store %arg6[%c0_6, %c0_7, %c0_8], %5 {strides = array<i32>} : memref<8x32x128xf32, #tpu.memory_space<vmem>>, vector<8x32x128xf32>,
    %c0_9 = arith.constant 0 : index
    %c0_10 = arith.constant 0 : index
    %c0_11 = arith.constant 0 : index
    %7 = vector.load %arg6[%c0_9, %c0_10, %c0_11] : memref<8x32x128xf32, #tpu.memory_space<vmem>>, vector<8x32x128xf32>
    %c0_12 = arith.constant 0 : index
    %c0_13 = arith.constant 0 : index
    %c128 = arith.constant 128 : index
    %8 = vector.load %arg2[%c0_12, %c0_13, %c128] : memref<8x32x256xf32, #tpu.memory_space<vmem>>, vector<8x32x128xf32>
    %9 = arith.addf %7, %8 : vector<8x32x128xf32>
    %c0_14 = arith.constant 0 : index
    %c0_15 = arith.constant 0 : index
    %c0_16 = arith.constant 0 : index
    %10 = vector.load %arg6[%c0_14, %c0_15, %c0_16] : memref<8x32x128xf32, #tpu.memory_space<vmem>>, vector<8x32x128xf32>
    tpu.vector_store %arg6[%c0_14, %c0_15, %c0_16], %9 {strides = array<i32>} : memref<8x32x128xf32, #tpu.memory_space<vmem>>, vector<8x32x128xf32>,
    %c0_i32_17 = arith.constant 0 : i32
    %11 = arith.cmpi eq, %arg1, %c0_i32_17 : i32
    %12 = arith.extui %11 : i1 to i32
    %c0_i32_18 = arith.constant 0 : i32
    %13 = arith.cmpi ne, %12, %c0_i32_18 : i32
    scf.if %13 {
      %c0_19 = arith.constant 0 : index
      %c0_20 = arith.constant 0 : index
      %c0_21 = arith.constant 0 : index
      %14 = vector.load %arg6[%c0_19, %c0_20, %c0_21] : memref<8x32x128xf32, #tpu.memory_space<vmem>>, vector<8x32x128xf32>
      %cst = arith.constant dense<0.000000e+00> : vector<8x32xf32>
      %15 = vector.multi_reduction <add>, %14, %cst [2] : vector<8x32x128xf32> to vector<8x32xf32>
      %c0_22 = arith.constant 0 : index
      %c0_23 = arith.constant 0 : index
      %16 = vector.load %arg3[%c0_22, %c0_23] : memref<32x16xf32, #tpu.memory_space<vmem>>, vector<32x16xf32>
      %cst_24 = arith.constant dense<0.000000e+00> : vector<8x16xf32>
      %17 = tpu.matmul %15, %16, %cst_24 {dimension_numbers = #tpu.dot_dimension_numbers<[1], [0], [0], [1], [0, 0, 1, 1], [], []>} : vector<8x32xf32>, vector<32x16xf32>, vector<8x16xf32> -> vector<8x16xf32>
      %c0_25 = arith.constant 0 : index
      %c0_26 = arith.constant 0 : index
      %18 = vector.load %arg4[%c0_25, %c0_26] : memref<1x16xf32, #tpu.memory_space<vmem>>, vector<1x16xf32>
      %19 = vector.broadcast %18 : vector<1x16xf32> to vector<8x16xf32>
      %20 = arith.addf %17, %19 : vector<8x16xf32>
      %21 = arith.negf %20 : vector<8x16xf32>
      %22 = math.exp %21 : vector<8x16xf32>
      %cst_27 = arith.constant 1.000000e+00 : f32
      %23 = vector.broadcast %cst_27 : f32 to vector<8x16xf32>
      %24 = arith.addf %23, %22 : vector<8x16xf32>
      %25 = arith.divf %23, %24 : vector<8x16xf32>
      %c0_28 = arith.constant 0 : index
      %c0_29 = arith.constant 0 : index
      %26 = vector.load %arg5[%c0_28, %c0_29] : memref<8x16xf32, #tpu.memory_space<vmem>>, vector<8x16xf32>
      tpu.vector_store %arg5[%c0_28, %c0_29], %25 {strides = array<i32>} : memref<8x16xf32, #tpu.memory_space<vmem>>, vector<8x16xf32>,
    } else {
    }
    return
  }
  func.func @transform_0(%arg0: i32, %arg1: i32) -> (i32, i32, i32) {
    %c0_i32 = arith.constant 0 : i32
    %c0_i32_0 = arith.constant 0 : i32
    return %arg0, %c0_i32, %arg1 : i32, i32, i32
  }
  func.func @transform_1(%arg0: i32, %arg1: i32) -> (i32, i32) {
    %c0_i32 = arith.constant 0 : i32
    %c0_i32_0 = arith.constant 0 : i32
    %c0_i32_1 = arith.constant 0 : i32
    return %c0_i32, %c0_i32_0 : i32, i32
  }
  func.func @transform_2(%arg0: i32, %arg1: i32) -> (i32, i32) {
    %c0_i32 = arith.constant 0 : i32
    %c0_i32_0 = arith.constant 0 : i32
    %c0_i32_1 = arith.constant 0 : i32
    return %c0_i32, %c0_i32_0 : i32, i32
  }
  func.func @transform_3(%arg0: i32, %arg1: i32) -> (i32, i32) {
    %c0_i32 = arith.constant 0 : i32
    %c0_i32_0 = arith.constant 0 : i32
    return %arg0, %c0_i32 : i32, i32
  }
}

</mosaic_0001>

<bundles_post_ra>
// kernel: tpu_custom_call.1
= control target key start
LH: loop header
LB: loop body
LE: loop exit
PB: predicated region body
PF: predicated region fallthrough
CT: control target
= control target key end

     0   :  { %8 = vsyncpa [#allocation4], 0  ;;  %s954_s0 = inlined_call_operand.hbm [shape: f32[8,32,256], index: 0, kind: input, shape index: {}]   ;;  %s955_s1 = inlined_call_operand.vmem [shape: f32[32,16], index: 1, kind: input, shape index: {}]   ;;  %s956_s2 = inlined_call_operand.vmem [shape: f32[1,16], index: 2, kind: input, shape index: {}]   ;;  %s957_s3 = inlined_call_operand.hbm [shape: f32[8,16], index: 3, kind: output, shape index: {}]  }
   0x1   :  { %9 = vsyncpa [#allocation5], 0  ;;  %s806_s12 = smov [#allocation3]  }
   0x2   :  { %s15_s13 = sshll.u32 %s806_s12, 4  ;;  %s16_s13 = int_to_ptr.vmem [resolvable:$true] %s15_s13 }
   0x3   :  { %s770_s14 = scalar_lea.vmem %s16_s13, 8192  ;;  %p775_p1 = scmp.lt.s32.totalorder %s16_s13, %s16_s13 }
   0x4   :  { %p771_p0 = scmp.ne.s32.totalorder %s16_s13, %s770_s14  ;;  %p776_p2 = scmp.lt.s32.totalorder %s770_s14, %s770_s14 }
   0x6   :  { %p777_p3 = por %p776_p2, %p775_p1 }
   0x8   :  { %p778_p4 = pnand %p777_p3, %p771_p0 }
   0xa   :  { %781 = shalt.err (!%p778_p4)
}
   0xb   :  { %s807_s15 = smov 256   ;;  %s808_s16 = smov 16  }
   0xc   :  { %21 = dma.hbm_to_vmem [thread:$0]  %s954_s0, 8192, %s16_s13, [#allocation4], %s807_s15, %s807_s15, %s808_s16  }
   0xd   :  { %802 = dma.done.wait [#allocation4], 8192  }
   0xe   :  { %803 = vsyncadd [#allocation4], 4294959104  ;;  %v101_v0 = vld [vmem:[#allocation3 + $0x40] sm:$0xff]  ;;  %v229_v1 = vld [vmem:[#allocation3 + $0x48] sm:$0xff]  ;;  %vm810_vm0 = vmmov 0   ;;  %vm474_vm1 = vcmask 130112  }
   0xf   :  { %v97_v2 = vld [vmem:[#allocation3] sm:$0xff]  ;;  %v261_v3 = vadd.f32 %v229_v1, %v101_v0  ;;  %v225_v4 = vld [vmem:[#allocation3 + $0x8] sm:$0xff]  ;;  %v102_v5 = vld [vmem:[#allocation3 + $0x50] sm:$0xff]  ;;  %vm481_vm2 = vcmask 195712   ;;  %vm488_vm3 = vcmask 261312   ;;  %vm623_vm4 = vcmask 1041409  }
  0x10   :  { %v230_v6 = vld [vmem:[#allocation3 + $0x58] sm:$0xff]  ;;  %v257_v7 = vadd.f32 %v225_v4, %v97_v2  ;;  %v98_v8 = vld [vmem:[#allocation3 + $0x10] sm:$0xff]  ;;  %v103_v12 = vld [vmem:[#allocation3 + $0x60] sm:$0xff]  ;;  %vm625_vm5 = vcmask 1042434   ;;  %vm627_vm6 = vcmask 1043459   ;;  %vm629_vm7 = vcmask 1044484  }
  0x11   :  { %v226_v9 = vld [vmem:[#allocation3 + $0x18] sm:$0xff]  ;;  %364 = vadd.xlane.f32.xlu1 %v261_v3  ;;  %v262_v10 = vadd.f32 %v230_v6, %v102_v5  ;;  %v231_v13 = vld [vmem:[#allocation3 + $0x68] sm:$0xff]  ;;  %v99_v14 = vld [vmem:[#allocation3 + $0x20] sm:$0xff]  ;;  %vm631_vm8 = vcmask 1045509   ;;  %vm633_vm9 = vcmask 1046534   ;;  %vm635_vm10 = vcmask 1047559  }
  0x12   :  { %356 = vadd.xlane.f32.xlu0 %v257_v7  ;;  %v258_v11 = vadd.f32 %v226_v9, %v98_v8  ;;  %v227_v15 = vld [vmem:[#allocation3 + $0x28] sm:$0xff]  ;;  %v263_v16 = vadd.f32 %v231_v13, %v103_v12  ;;  %v106_v18 = vld [vmem:[#allocation3 + $0x90] sm:$0xff]  ;;  %v234_v19 = vld [vmem:[#allocation3 + $0x98] sm:$0xff]  ;;  %vm637_vm11 = vcmask 261120   ;;  %s811_s27 = smov [#allocation6]   ;;  %vm716_vm12 = vcmask 130048  }
  0x13   :  { %v259_v17 = vadd.f32 %v227_v15, %v99_v14  ;;  %v105_v20 = vld [vmem:[#allocation3 + $0x80] sm:$0xff]  ;;  %v233_v21 = vld [vmem:[#allocation3 + $0x88] sm:$0xff]  ;;  %v266_v22 = vadd.f32 %v234_v19, %v106_v18  ;;  %v104_v24 = vld [vmem:[#allocation3 + $0x70] sm:$0xff]  ;;  %s724_s28 = sshll.u32 %s811_s27, 4  ;;  %s725_s28 = int_to_ptr.vmem [resolvable:$true] %s724_s28 }
  0x14   :  { %v265_v23 = vadd.f32 %v233_v21, %v105_v20  ;;  %v232_v25 = vld [vmem:[#allocation3 + $0x78] sm:$0xff]  ;;  %v100_v26 = vld [vmem:[#allocation3 + $0x30] sm:$0xff]  ;;  %v109_v30 = vld [vmem:[#allocation3 + $0xc0] sm:$0xff]  ;;  %s782_s29 = scalar_lea.vmem %s725_s28, 128  ;;  %p787_p6 = scmp.lt.s32.totalorder %s725_s28, %s725_s28 }
  0x15   :  { %366 = vadd.xlane.f32.xlu1 %v262_v10  ;;  %v228_v27 = vld [vmem:[#allocation3 + $0x38] sm:$0xff]  ;;  %v264_v28 = vadd.f32 %v232_v25, %v104_v24  ;;  %v237_v31 = vld [vmem:[#allocation3 + $0xc8] sm:$0xff]  ;;  %v107_v32 = vld [vmem:[#allocation3 + $0xa0] sm:$0xff]  ;;  %p783_p5 = scmp.ne.s32.totalorder %s725_s28, %s782_s29  ;;  %p788_p7 = scmp.lt.s32.totalorder %s782_s29, %s782_s29 }
  0x16   :  { %358 = vadd.xlane.f32.xlu0 %v258_v11  ;;  %v260_v29 = vadd.f32 %v228_v27, %v100_v26  ;;  %v235_v33 = vld [vmem:[#allocation3 + $0xa8] sm:$0xff]  ;;  %v269_v34 = vadd.f32 %v237_v31, %v109_v30  ;;  %v108_v36 = vld [vmem:[#allocation3 + $0xb0] sm:$0xff]  ;;  %v236_v37 = vld [vmem:[#allocation3 + $0xb8] sm:$0xff] }
  0x17   :  { %v267_v35 = vadd.f32 %v235_v33, %v107_v32  ;;  %v110_v38 = vld [vmem:[#allocation3 + $0xd0] sm:$0xff]  ;;  %v238_v39 = vld [vmem:[#allocation3 + $0xd8] sm:$0xff]  ;;  %v268_v40 = vadd.f32 %v236_v37, %v108_v36  ;;  %v113_v42 = vld [vmem:[#allocation3 + $0x100] sm:$0xff]  ;;  %v809_v32 = vmov 0.0   ;;  %p789_p8 = por %p788_p7, %p787_p6 }
  0x18   :  { %v270_v41 = vadd.f32 %v238_v39, %v110_v38  ;;  %v241_v43 = vld [vmem:[#allocation3 + $0x108] sm:$0xff]  ;;  %v111_v44 = vld [vmem:[#allocation3 + $0xe0] sm:$0xff]  ;;  %v112_v48 = vld [vmem:[#allocation3 + $0xf0] sm:$0xff]  ;;  %741 = vmatprep.subr.mxu0 %v809_v32  ;;  %749 = vmatprep.mubr.msk.f32.mxu0 %vm810_vm0, %v809_v32 }
  0x19   :  { %368 = vadd.xlane.f32.xlu1 %v263_v16  ;;  %v239_v45 = vld [vmem:[#allocation3 + $0xe8] sm:$0xff]  ;;  %v273_v46 = vadd.f32 %v241_v43, %v113_v42  ;;  %v240_v49 = vld [vmem:[#allocation3 + $0xf8] sm:$0xff]  ;;  %v114_v50 = vld [vmem:[#allocation3 + $0x110] sm:$0xff]  ;;  %p790_p9 = pnand %p789_p8, %p783_p5 }
  0x1a   :  { %360 = vadd.xlane.f32.xlu0 %v259_v17  ;;  %v271_v47 = vadd.f32 %v239_v45, %v111_v44  ;;  %v242_v51 = vld [vmem:[#allocation3 + $0x118] sm:$0xff]  ;;  %v272_v52 = vadd.f32 %v240_v49, %v112_v48  ;;  %v117_v54 = vld [vmem:[#allocation3 + $0x140] sm:$0xff]  ;;  %v245_v55 = vld [vmem:[#allocation3 + $0x148] sm:$0xff] }
  0x1b   :  { %v274_v53 = vadd.f32 %v242_v51, %v114_v50  ;;  %v115_v56 = vld [vmem:[#allocation3 + $0x120] sm:$0xff]  ;;  %v243_v57 = vld [vmem:[#allocation3 + $0x128] sm:$0xff]  ;;  %v277_v58 = vadd.f32 %v245_v55, %v117_v54  ;;  %v116_v60 = vld [vmem:[#allocation3 + $0x130] sm:$0xff] }
  0x1c   :  { %v275_v59 = vadd.f32 %v243_v57, %v115_v56  ;;  %v244_v61 = vld [vmem:[#allocation3 + $0x138] sm:$0xff]  ;;  %v118_v62 = vld [vmem:[#allocation3 + $0x150] sm:$0xff]  ;;  %v121_v2 = vld [vmem:[#allocation3 + $0x180] sm:$0xff] }
  0x1d   :  { %374 = vadd.xlane.f32.xlu1 %v266_v22  ;;  %v246_v63 = vld [vmem:[#allocation3 + $0x158] sm:$0xff]  ;;  %v276_v0 = vadd.f32 %v244_v61, %v116_v60  ;;  %v249_v3 = vld [vmem:[#allocation3 + $0x188] sm:$0xff]  ;;  %v119_v4 = vld [vmem:[#allocation3 + $0x160] sm:$0xff] }
  0x1e   :  { %372 = vadd.xlane.f32.xlu0 %v265_v23  ;;  %v278_v1 = vadd.f32 %v246_v63, %v118_v62  ;;  %v247_v5 = vld [vmem:[#allocation3 + $0x168] sm:$0xff]  ;;  %v281_v6 = vadd.f32 %v249_v3, %v121_v2  ;;  %v120_v8 = vld [vmem:[#allocation3 + $0x170] sm:$0xff]  ;;  %v248_v9 = vld [vmem:[#allocation3 + $0x178] sm:$0xff] }
  0x1f   :  { %v279_v7 = vadd.f32 %v247_v5, %v119_v4  ;;  %v122_v10 = vld [vmem:[#allocation3 + $0x190] sm:$0xff]  ;;  %v250_v11 = vld [vmem:[#allocation3 + $0x198] sm:$0xff]  ;;  %v280_v12 = vadd.f32 %v248_v9, %v120_v8  ;;  %v125_v14 = vld [vmem:[#allocation3 + $0x1c0] sm:$0xff] }
  0x20   :  { %v282_v13 = vadd.f32 %v250_v11, %v122_v10  ;;  %v253_v15 = vld [vmem:[#allocation3 + $0x1c8] sm:$0xff]  ;;  %v123_v16 = vld [vmem:[#allocation3 + $0x1a0] sm:$0xff]  ;;  %v124_v20 = vld [vmem:[#allocation3 + $0x1b0] sm:$0xff] }
  0x21   :  { %370 = vadd.xlane.f32.xlu1 %v264_v28  ;;  %v251_v17 = vld [vmem:[#allocation3 + $0x1a8] sm:$0xff]  ;;  %v285_v18 = vadd.f32 %v253_v15, %v125_v14  ;;  %v252_v21 = vld [vmem:[#allocation3 + $0x1b8] sm:$0xff]  ;;  %v126_v22 = vld [vmem:[#allocation3 + $0x1d0] sm:$0xff] }
  0x22   :  { %362 = vadd.xlane.f32.xlu0 %v260_v29  ;;  %v283_v19 = vadd.f32 %v251_v17, %v123_v16  ;;  %v254_v23 = vld [vmem:[#allocation3 + $0x1d8] sm:$0xff]  ;;  %v284_v24 = vadd.f32 %v252_v21, %v124_v20  ;;  %v128_v26 = vld [vmem:[#allocation3 + $0x1f0] sm:$0xff]  ;;  %v127_v28 = vld [vmem:[#allocation3 + $0x1e0] sm:$0xff] }
  0x23   :  { %v286_v25 = vadd.f32 %v254_v23, %v126_v22  ;;  %v256_v27 = vld [vmem:[#allocation3 + $0x1f8] sm:$0xff]  ;;  %v255_v29 = vld [vmem:[#allocation3 + $0x1e8] sm:$0xff]  ;;  %v420_v36 = vld [vmem:[%s955_s1] sm:$0xff] }
  0x24   :  { %v288_v30 = vadd.f32 %v256_v27, %v128_v26  ;;  %v287_v31 = vadd.f32 %v255_v29, %v127_v28  ;;  %v423_v33 = vld [vmem:[%s955_s1 + $0x18] sm:$0xff] }
  0x25   :  { %380 = vadd.xlane.f32.xlu1 %v269_v34  ;;  %742 = vmatpush3.msra.mxu0 %v423_v33  ;;  %v422_v34 = vld [vmem:[%s955_s1 + $0x10] sm:$0xff] }
  0x26   :  { %376 = vadd.xlane.f32.xlu0 %v267_v35  ;;  %743 = vmatprep.subr.mxu0 %v809_v32  ;;  %v421_v35 = vld [vmem:[%s955_s1 + $0x8] sm:$0xff] }
  0x27   :  { %744 = vmatpush3.msra.mxu0 %v422_v34 }
  0x28   :  { %745 = vmatprep.subr.mxu0 %v809_v32 }
  0x29   :  { %378 = vadd.xlane.f32.xlu1 %v268_v40  ;;  %746 = vmatpush3.msra.mxu0 %v421_v35 }
  0x2a   :  { %382 = vadd.xlane.f32.xlu0 %v270_v41  ;;  %747 = vmatprep.subr.mxu0 %v809_v32 }
  0x2b   :  { %748 = vmatpush3.msra.mxu0 %v420_v36 }
  0x2d   :  { %388 = vadd.xlane.f32.xlu1 %v273_v46 }
  0x2e   :  { %384 = vadd.xlane.f32.xlu0 %v271_v47 }
  0x31   :  { %386 = vadd.xlane.f32.xlu1 %v272_v52 }
  0x32   :  { %390 = vadd.xlane.f32.xlu0 %v274_v53  ;;  %v463_v53 = vlaneseq }
  0x34   :  { %v464_v56 = vand.u32 127, %v463_v53  ;;  %v466_v61 = vshrl.u32 %v463_v53, 7 }
  0x35   :  { %396 = vadd.xlane.f32.xlu1 %v277_v58 }
  0x36   :  { %392 = vadd.xlane.f32.xlu0 %v275_v59  ;;  %v469_v57 = vadd.s32 4294967288, %v464_v56  ;;  %v476_v59 = vadd.s32 4294967280, %v464_v56  ;;  %v483_v62 = vadd.s32 4294967272, %v464_v56  ;;  %v871_v3 = vsub.s32 %v464_v56, %v466_v61 }
  0x38   :  { %v863_v63 = vsub.s32 %v469_v57, %v466_v61  ;;  %v873_v4 = vsub.s32 %v483_v62, %v466_v61 }
  0x39   :  { %394 = vadd.xlane.f32.xlu1 %v276_v0 }
  0x3a   :  { %398 = vadd.xlane.f32.xlu0 %v278_v1  ;;  %v867_v1 = vsub.s32 %v476_v59, %v466_v61 }
  0x3d   :  { %404 = vadd.xlane.f32.xlu1 %v281_v6 }
  0x3e   :  { %400 = vadd.xlane.f32.xlu0 %v279_v7 }
  0x41   :  { %402 = vadd.xlane.f32.xlu1 %v280_v12 }
  0x42   :  { %406 = vadd.xlane.f32.xlu0 %v282_v13 }
  0x45   :  { %412 = vadd.xlane.f32.xlu1 %v285_v18 }
  0x46   :  { %408 = vadd.xlane.f32.xlu0 %v283_v19 }
  0x49   :  { %410 = vadd.xlane.f32.xlu1 %v284_v24 }
  0x4a   :  { %414 = vadd.xlane.f32.xlu0 %v286_v25 }
  0x4d   :  { %418 = vadd.xlane.f32.xlu1 %v288_v30 }
  0x4e   :  { %416 = vadd.xlane.f32.xlu0 %v287_v31 }
  0x9a   :  { %v365_v37 = vpop.xlane.xlu1 %364 }
  0x9b   :  { %v357_v38 = vpop.xlane.xlu0 %356  ;;  %v493_v11 = vrot.slane %v365_v37, %v871_v3 }
  0x9c   :  { %v468_v12 = vrot.slane %v357_v38, %v871_v3 }
  0x9e   :  { %v367_v39 = vpop.xlane.xlu1 %366 }
  0x9f   :  { %v359_v40 = vpop.xlane.xlu0 %358  ;;  %v497_v5 = vrot.slane %v367_v39, %v863_v63 }
  0xa0   :  { %v473_v6 = vrot.slane %v359_v40, %v863_v63 }
  0xa1   :  { %v498_v15 = vsel %vm474_vm1, %v497_v5, %v493_v11 }
  0xa2   :  { %v369_v41 = vpop.xlane.xlu1 %368  ;;  %v475_v16 = vsel %vm474_vm1, %v473_v6, %v468_v12 }
  0xa3   :  { %v361_v42 = vpop.xlane.xlu0 %360  ;;  %v502_v8 = vrot.slane %v369_v41, %v867_v1 }
  0xa4   :  { %v480_v9 = vrot.slane %v361_v42, %v867_v1 }
  0xa5   :  { %v503_v18 = vsel %vm481_vm2, %v502_v8, %v498_v15 }
  0xa6   :  { %v375_v43 = vpop.xlane.xlu1 %374  ;;  %v482_v19 = vsel %vm481_vm2, %v480_v9, %v475_v16 }
  0xa7   :  { %v373_v44 = vpop.xlane.xlu0 %372  ;;  %v516_v20 = vrot.slane %v375_v43, %v863_v63 }
  0xa8   :  { %v512_v21 = vrot.slane %v373_v44, %v871_v3 }
  0xaa   :  { %v371_v45 = vpop.xlane.xlu1 %370  ;;  %v517_v28 = vsel %vm474_vm1, %v516_v20, %v512_v21 }
  0xab   :  { %v363_v46 = vpop.xlane.xlu0 %362  ;;  %v507_v13 = vrot.slane %v371_v45, %v873_v4 }
  0xac   :  { %v487_v14 = vrot.slane %v363_v46, %v873_v4 }
  0xad   :  { %v508_v23 = vsel %vm488_vm3, %v507_v13, %v503_v18 }
  0xae   :  { %v847_v47 = vpop.xlane.xlu1 %380  ;;  %v489_v24 = vsel %vm488_vm3, %v487_v14, %v482_v19 }
  0xaf   :  { %v377_v48 = vpop.xlane.xlu0 %376  ;;  %v624_v29 = vsel %vm623_vm4, %v508_v23, %v489_v24  ;;  %v531_v32 = vrot.slane %v847_v47, %v871_v3 }
  0xb0   :  { %v521_v25 = vrot.slane %v377_v48, %v867_v1 }
  0xb2   :  { %v379_v49 = vpop.xlane.xlu1 %378  ;;  %v522_v33 = vsel %vm481_vm2, %v521_v25, %v517_v28 }
  0xb3   :  { %v849_v50 = vpop.xlane.xlu0 %382  ;;  %v526_v26 = vrot.slane %v379_v49, %v873_v4 }
  0xb4   :  { %v535_v30 = vrot.slane %v849_v50, %v863_v63 }
  0xb5   :  { %v527_v36 = vsel %vm488_vm3, %v526_v26, %v522_v33 }
  0xb6   :  { %v851_v51 = vpop.xlane.xlu1 %388  ;;  %v536_v45 = vsel %vm474_vm1, %v535_v30, %v531_v32 }
  0xb7   :  { %v853_v52 = vpop.xlane.xlu0 %384  ;;  %v550_v40 = vrot.slane %v851_v51, %v871_v3 }
  0xb8   :  { %v540_v34 = vrot.slane %v853_v52, %v867_v1 }
  0xba   :  { %v855_v54 = vpop.xlane.xlu1 %386  ;;  %v541_v50 = vsel %vm481_vm2, %v540_v34, %v536_v45 }
  0xbb   :  { %v857_v55 = vpop.xlane.xlu0 %390  ;;  %v545_v37 = vrot.slane %v855_v54, %v873_v4 }
  0xbc   :  { %v554_v35 = vrot.slane %v857_v55, %v863_v63 }
  0xbd   :  { %v546_v54 = vsel %vm488_vm3, %v545_v37, %v541_v50 }
  0xbe   :  { %v859_v58 = vpop.xlane.xlu1 %396  ;;  %v555_v51 = vsel %vm474_vm1, %v554_v35, %v550_v40 }
  0xbf   :  { %v861_v60 = vpop.xlane.xlu0 %392  ;;  %v569_v46 = vrot.slane %v859_v58, %v871_v3  ;;  %v626_v58 = vsel %vm625_vm5, %v527_v36, %v624_v29 }
  0xc0   :  { %v559_v38 = vrot.slane %v861_v60, %v867_v1 }
  0xc2   :  { %v865_v0 = vpop.xlane.xlu1 %394  ;;  %v560_v55 = vsel %vm481_vm2, %v559_v38, %v555_v51 }
  0xc3   :  { %v869_v2 = vpop.xlane.xlu0 %398  ;;  %v564_v41 = vrot.slane %v865_v0, %v873_v4 }
  0xc4   :  { %v573_v39 = vrot.slane %v869_v2, %v863_v63 }
  0xc5   :  { %v565_v59 = vsel %vm488_vm3, %v564_v41, %v560_v55 }
  0xc6   :  { %v877_v7 = vpop.xlane.xlu1 %404  ;;  %v574_v56 = vsel %vm474_vm1, %v573_v39, %v569_v46 }
  0xc7   :  { %v401_v10 = vpop.xlane.xlu0 %400  ;;  %v588_v52 = vrot.slane %v877_v7, %v871_v3 }
  0xc8   :  { %v578_v42 = vrot.slane %v401_v10, %v867_v1 }
  0xca   :  { %v403_v17 = vpop.xlane.xlu1 %402  ;;  %v579_v60 = vsel %vm481_vm2, %v578_v42, %v574_v56 }
  0xcb   :  { %v407_v22 = vpop.xlane.xlu0 %406  ;;  %v583_v47 = vrot.slane %v403_v17, %v873_v4 }
  0xcc   :  { %v592_v43 = vrot.slane %v407_v22, %v863_v63 }
  0xcd   :  { %v584_v0 = vsel %vm488_vm3, %v583_v47, %v579_v60 }
  0xce   :  { %v413_v27 = vpop.xlane.xlu1 %412  ;;  %v593_v61 = vsel %vm474_vm1, %v592_v43, %v588_v52 }
  0xcf   :  { %v409_v31 = vpop.xlane.xlu0 %408  ;;  %v607_v2 = vrot.slane %v413_v27, %v871_v3 }
  0xd0   :  { %v597_v48 = vrot.slane %v409_v31, %v867_v1 }
  0xd2   :  { %v411_v44 = vpop.xlane.xlu1 %410  ;;  %v598_v5 = vsel %vm481_vm2, %v597_v48, %v593_v61 }
  0xd3   :  { %v415_v49 = vpop.xlane.xlu0 %414  ;;  %v602_v53 = vrot.slane %v411_v44, %v873_v4 }
  0xd4   :  { %v611_v57 = vrot.slane %v415_v49, %v863_v63  ;;  %v628_v63 = vsel %vm627_vm6, %v546_v54, %v626_v58 }
  0xd5   :  { %v603_v8 = vsel %vm488_vm3, %v602_v53, %v598_v5  ;;  %v630_v10 = vsel %vm629_vm7, %v565_v59, %v628_v63 }
  0xd6   :  { %v419_v62 = vpop.xlane.xlu1 %418  ;;  %v612_v11 = vsel %vm474_vm1, %v611_v57, %v607_v2  ;;  %v632_v12 = vsel %vm631_vm8, %v584_v0, %v630_v10 }
  0xd7   :  { %v417_v6 = vpop.xlane.xlu0 %416  ;;  %v621_v7 = vrot.slane %v419_v62, %v873_v4  ;;  %v634_v4 = vsel %vm633_vm9, %v603_v8, %v632_v12 }
  0xd8   :  { %v616_v9 = vrot.slane %v417_v6, %v867_v1  ;;  %v733_v1 = vld [vmem:[%s956_s2] ss:$0 sm:$0xff] }
  0xda   :  { %v617_v3 = vsel %vm481_vm2, %v616_v9, %v612_v11 }
  0xdb   :  { %v622_v13 = vsel %vm488_vm3, %v621_v7, %v617_v3 }
  0xdc   :  { %v636_v14 = vsel %vm635_vm10, %v622_v13, %v634_v4 }
  0xdd   :  { %750 = vmatmul.mubr.msk.f32.vlgmr.msra.gmra.mxu0 %vm637_vm11, %v636_v14 }
 0x19d   :  { %v706_v15 = vpop.f32.mrf.mxu0 }
 0x19e   :  { %v707_v16 = vadd.f32 %v733_v1, %v706_v15 }
 0x19f   :  { %v751_v17 = vpop.f32.mrf.mxu0 }
 0x1a0   :  { %v735_v18 = vmul.f32 -1.442695, %v707_v16 }
 0x1a2   :  { %758 = vpow2.f32 %v735_v18 }
 0x1af   :  { %v759_v19 = vpop.eup %758 }
 0x1b0   :  { %v713_v20 = vadd.f32 1.0, %v759_v19 }
 0x1b2   :  { %760 = vrcp.f32 %v713_v20 }
 0x1bf   :  { %v761_v21 = vpop.eup %760 }
 0x1c0   :  { %717 = vst.msk [vmem:[#allocation6] sm:$0xff] %vm716_vm12, %v761_v21 }
 0x1c1   :  { %793 = shalt.err (!%p790_p9)
}
 0x1c2   :  { %727 = dma.vmem_to_hbm [thread:$0]  %s725_s28, 128, %s957_s3, [#allocation5]  }
 0x1c3   :  { %804 = dma.done.wait [#allocation5], 128  }
 0x1c4   :  { %805 = vsyncadd [#allocation5], 4294967168 }
 0x1c5   :  { %731 = vsyncpa [#allocation4], 1 }
 0x1c6   :  { %732 = vsyncpa [#allocation5], 1 }

</bundles_post_ra>
